<compile_context>
chip_gen: v6e
topology: v6e:2x2x1
jax: 0.10.0
libtpu: 0.0.40
codegen_flags: <defaults>
</compile_context>

<pallas_src>
import jax
import jax.numpy as jnp
from jax.experimental import pallas as pl
from jax.experimental.pallas import tpu as pltpu


# ----------------------------------------------------------------------------
# Kernel A: smooth-L1 (pos-masked) sum, positive-classification sum, and the
# per-element hard-negative mining score  -neg * log(1 - sigmoid(psm) + 1e-6).
# Scalar sums accumulate into per-batch (1, 8, 128) blocks (every element of the
# block carries the same running sum -> no single-element VMEM RMW stores).
# ----------------------------------------------------------------------------
def _main_kernel(rm_ref, tg_ref, pos_ref, neg_ref, psm_ref,
                 reg_ref, clspos_ref, mining_ref):
    i = pl.program_id(1)

    @pl.when(i == 0)
    def _():
        reg_ref[...] = jnp.zeros(reg_ref.shape, reg_ref.dtype)
        clspos_ref[...] = jnp.zeros(clspos_ref.shape, clspos_ref.dtype)

    rm = rm_ref[0].astype(jnp.float32)      # (A, 7, T)
    tg = tg_ref[0].astype(jnp.float32)      # (A, 7, T)
    pos = pos_ref[0].astype(jnp.float32)    # (A, T)
    neg = neg_ref[0].astype(jnp.float32)    # (A, T)
    psm = psm_ref[0].astype(jnp.float32)    # (A, T)

    # --- regression: SmoothL1(sum) of pos-masked residuals ---
    # pos in {0,1}: smoothl1(pos*rm - pos*tg) == pos * smoothl1(rm - tg) elementwise.
    d = rm - tg
    ad = jnp.abs(d)
    sl1 = jnp.where(ad < 1.0, 0.5 * ad * ad, ad - 0.5)
    reg_ref[...] += jnp.sum(pos[:, None, :] * sl1)

    # --- classification positive term ---
    p_pos = jax.nn.sigmoid(psm)
    clspos_ref[...] += jnp.sum(-pos * jnp.log(p_pos + 1e-6))

    # --- mining score (lane-dense full-array output) ---
    nl = jnp.log(1.0 - p_pos + 1e-6)
    mining_ref[0] = (-neg * nl).astype(mining_ref.dtype)


# ----------------------------------------------------------------------------
# Kernel B: negative-classification reduction under the mined mask.
# Recomputes the negative log term from psm (no neg_log HBM round-trip).
# ----------------------------------------------------------------------------
def _neg_kernel(psm_ref, mask_ref, negsum_ref):
    i = pl.program_id(1)

    @pl.when(i == 0)
    def _():
        negsum_ref[...] = jnp.zeros(negsum_ref.shape, negsum_ref.dtype)

    psm = psm_ref[0].astype(jnp.float32)    # (A, T)
    m = mask_ref[0].astype(jnp.float32)     # (A, T)
    nl = jnp.log(1.0 - jax.nn.sigmoid(psm) + 1e-6)
    negsum_ref[...] += jnp.sum(-m * nl)


# ----------------------------------------------------------------------------
# JAX glue: hard negative mining with dynamic k per (batch, frame).
# TODO(synk): torch.topk with data-dependent k has no Pallas TPU sort/top-k
#             primitive; implemented as one batched double-argsort rank trick.
# ----------------------------------------------------------------------------
def _hard_negative_mining(mining, fps, neg_ratio, n_frame, na):
    B, A, HW = mining.shape
    n = HW * na
    # Flatten each (batch, frame) slice in torch's (H, W, anchor) order for tie parity.
    scores = mining.reshape(B, n_frame, na, HW)
    scores = jnp.transpose(scores, (0, 1, 3, 2)).reshape(B * n_frame, n)
    k = jnp.floor(neg_ratio * (fps.reshape(B * n_frame) + 1.0)).astype(jnp.int32)
    order = jnp.argsort(-scores, axis=-1)   # descending, stable
    ranks = jnp.argsort(order, axis=-1)     # rank of each element in descending order
    mask = (ranks < k[:, None]).astype(mining.dtype)
    mask = jnp.transpose(mask.reshape(B, n_frame, HW, na), (0, 1, 3, 2)).reshape(B, A, HW)
    return mask


def _pick_tile(hw):
    # Largest lane-dense tile (multiple of 128) that divides HW; else the full extent
    # (allowed: block dim equal to the array dim), which keeps lanes ~dense anyway.
    for t in (2048, 1024, 512, 256, 128):
        if hw % t == 0:
            return t
    return hw


# ----------------------------------------------------------------------------
# Wrapper
# ----------------------------------------------------------------------------
def lrm_loss_v2(rm, psm, pos_equal_one, neg_equal_one, targets, cfg):
    B, C_reg, H, W = rm.shape
    A = psm.shape[1]
    assert C_reg == A * 7
    n_frame = int(cfg["n_frame"])
    na = int(cfg["anchors_per_position"])
    assert n_frame * na == A
    HW = H * W
    T = _pick_tile(HW)
    f32 = jnp.float32

    # Lane-dense channels-first flattening (HW is the minor/lane axis).
    rm_cf = rm.reshape(B, A, 7, HW).astype(f32)                              # pure reshape
    tg_cf = jnp.transpose(targets, (0, 3, 1, 2)).reshape(B, A, 7, HW).astype(f32)
    psm_cf = psm.reshape(B, A, HW).astype(f32)                               # pure reshape
    pos_cf = jnp.transpose(pos_equal_one, (0, 3, 1, 2)).reshape(B, A, HW).astype(f32)
    neg_cf = jnp.transpose(neg_equal_one, (0, 3, 1, 2)).reshape(B, A, HW).astype(f32)

    grid = (B, HW // T)
    cparams = pltpu.CompilerParams(
        dimension_semantics=("parallel", "arbitrary"),
        vmem_limit_bytes=48 * 1024 * 1024)

    reg_part, clspos_part, mining = pl.pallas_call(
        _main_kernel,
        out_shape=(
            jax.ShapeDtypeStruct((B, 8, 128), f32),     # per-batch smooth-L1 sum
            jax.ShapeDtypeStruct((B, 8, 128), f32),     # per-batch cls-pos sum
            jax.ShapeDtypeStruct((B, A, HW), f32),      # mining score
        ),
        grid_spec=pltpu.PrefetchScalarGridSpec(
            num_scalar_prefetch=0,
            grid=grid,
            in_specs=[
                pl.BlockSpec((1, A, 7, T), lambda b, i: (b, 0, 0, i)),
                pl.BlockSpec((1, A, 7, T), lambda b, i: (b, 0, 0, i)),
                pl.BlockSpec((1, A, T), lambda b, i: (b, 0, i)),
                pl.BlockSpec((1, A, T), lambda b, i: (b, 0, i)),
                pl.BlockSpec((1, A, T), lambda b, i: (b, 0, i)),
            ],
            out_specs=(
                pl.BlockSpec((1, 8, 128), lambda b, i: (b, 0, 0)),
                pl.BlockSpec((1, 8, 128), lambda b, i: (b, 0, 0)),
                pl.BlockSpec((1, A, T), lambda b, i: (b, 0, i)),
            ),
        ),
        compiler_params=cparams,
    )(rm_cf, tg_cf, pos_cf, neg_cf, psm_cf)

    # Tiny counts done in glue: per-(batch, frame) positive counts + totals.
    fps = pos_cf.reshape(B, n_frame, na, HW).sum(axis=(2, 3))   # (B, n_frame)
    pos_total = fps.sum()

    # Hard negative mining (replaces neg_equal_one, as in the torch in-place update).
    new_mask = _hard_negative_mining(mining, fps, float(cfg["neg_ratio"]), n_frame, na)
    mask_sum = new_mask.sum()

    neg_part = pl.pallas_call(
        _neg_kernel,
        out_shape=jax.ShapeDtypeStruct((B, 8, 128), f32),
        grid_spec=pltpu.PrefetchScalarGridSpec(
            num_scalar_prefetch=0,
            grid=grid,
            in_specs=[
                pl.BlockSpec((1, A, T), lambda b, i: (b, 0, i)),
                pl.BlockSpec((1, A, T), lambda b, i: (b, 0, i)),
            ],
            out_specs=pl.BlockSpec((1, 8, 128), lambda b, i: (b, 0, 0)),
        ),
        compiler_params=cparams,
    )(psm_cf, new_mask)

    reg_sum = reg_part[:, 0, 0].sum()
    cls_pos_sum = clspos_part[:, 0, 0].sum()
    neg_sum = neg_part[:, 0, 0].sum()

    reg_loss = cfg["gamma"] * reg_sum / (pos_total + 1e-6)
    cls_pos_loss = cfg["alpha"] * cls_pos_sum / (pos_total + 1e-6)
    cls_neg_loss = cfg["beta"] * neg_sum / (mask_sum + 1e-6)
    conf_loss = cls_pos_loss + cls_neg_loss
    return conf_loss, reg_loss, cls_pos_loss, cls_neg_loss


if __name__ == "__main__":
    # cfg hyperparameters (the module has no learnable weights)
    n_frame, na = 5, 2                       # n_frame * anchors_per_position = 10
    cfg = dict(neg_ratio=3.0, alpha=1.5, beta=1.0, gamma=2.0,
               anchors_per_position=na, n_frame=n_frame)

    B, H, W = 2, 16, 16                      # small spatial grid (module uses 50x44)
    A = n_frame * na                         # 10
    C_reg = A * 7                            # 70

    key = jax.random.PRNGKey(0)
    k1, k2, k3, k4, k5 = jax.random.split(key, 5)
    rm = jax.random.normal(k1, (B, C_reg, H, W), jnp.float32)
    psm = jax.random.normal(k2, (B, A, H, W), jnp.float32)
    targets = jax.random.normal(k3, (B, H, W, C_reg), jnp.float32)
    pos_equal_one = (jax.random.uniform(k4, (B, H, W, A)) < 0.05).astype(jnp.float32)
    neg_equal_one = jnp.logical_and(
        jax.random.uniform(k5, (B, H, W, A)) < 0.7,
        pos_equal_one == 0.0).astype(jnp.float32)

    conf_loss, reg_loss, cls_pos_loss, cls_neg_loss = lrm_loss_v2(
        rm, psm, pos_equal_one, neg_equal_one, targets, cfg)
    jax.block_until_ready((conf_loss, reg_loss, cls_pos_loss, cls_neg_loss))

    # pure-JAX spot check of the Pallas reductions (reg + cls_pos paths)
    rm_r = jnp.transpose(rm, (0, 2, 3, 1)).reshape(B, H, W, A, 7)
    tg_r = targets.reshape(B, H, W, A, 7)
    pm = pos_equal_one[..., None]
    d = pm * rm_r - pm * tg_r
    ad = jnp.abs(d)
    ref_reg = cfg["gamma"] * jnp.where(ad < 1.0, 0.5 * ad * ad, ad - 0.5).sum() / (
        pos_equal_one.sum() + 1e-6)
    p_pos = jax.nn.sigmoid(jnp.transpose(psm, (0, 2, 3, 1)))
    ref_cls_pos = cfg["alpha"] * (-pos_equal_one * jnp.log(p_pos + 1e-6)).sum() / (
        pos_equal_one.sum() + 1e-6)
    assert bool(jnp.allclose(reg_loss, ref_reg, rtol=1e-3, atol=1e-5))
    assert bool(jnp.allclose(cls_pos_loss, ref_cls_pos, rtol=1e-3, atol=1e-5))
    assert all(bool(jnp.isfinite(x)) for x in
               (conf_loss, reg_loss, cls_pos_loss, cls_neg_loss))
    print("KERNEL_OK")
</pallas_src>

<mosaic_0001>
module attributes {stable_mosaic.version = 11 : i64} {
  func.func @_main_kernel(%arg0: i32, %arg1: i32, %arg2: memref<1x10x7x256xf32, #tpu.memory_space<vmem>>, %arg3: memref<1x10x7x256xf32, #tpu.memory_space<vmem>>, %arg4: memref<1x10x256xf32, #tpu.memory_space<vmem>>, %arg5: memref<1x10x256xf32, #tpu.memory_space<vmem>>, %arg6: memref<1x10x256xf32, #tpu.memory_space<vmem>>, %arg7: memref<1x8x128xf32, #tpu.memory_space<vmem>>, %arg8: memref<1x8x128xf32, #tpu.memory_space<vmem>>, %arg9: memref<1x10x256xf32, #tpu.memory_space<vmem>>) attributes {dimension_semantics = [#tpu.dimension_semantics<parallel>, #tpu.dimension_semantics<arbitrary>], iteration_bounds = array<i64: 2, 1>, scalar_prefetch = 0 : i64, scratch_operands = 0 : i64, tpu.core_type = #tpu.core_type<tc>, window_params = [{transform_indices = @transform_0, window_bounds = array<i64: 1, 10, 7, 256>}, {transform_indices = @transform_1, window_bounds = array<i64: 1, 10, 7, 256>}, {transform_indices = @transform_2, window_bounds = array<i64: 1, 10, 256>}, {transform_indices = @transform_3, window_bounds = array<i64: 1, 10, 256>}, {transform_indices = @transform_4, window_bounds = array<i64: 1, 10, 256>}, {transform_indices = @transform_5, window_bounds = array<i64: 1, 8, 128>}, {transform_indices = @transform_6, window_bounds = array<i64: 1, 8, 128>}, {transform_indices = @transform_7, window_bounds = array<i64: 1, 10, 256>}]} {
    %c0_i32 = arith.constant 0 : i32
    %0 = arith.cmpi eq, %arg1, %c0_i32 : i32
    %1 = arith.extui %0 : i1 to i32
    %c0_i32_0 = arith.constant 0 : i32
    %2 = arith.cmpi ne, %1, %c0_i32_0 : i32
    scf.if %2 {
      %cst_42 = arith.constant 0.000000e+00 : f32
      %64 = vector.broadcast %cst_42 : f32 to vector<1x8x128xf32>
      %c0_43 = arith.constant 0 : index
      %c0_44 = arith.constant 0 : index
      %c0_45 = arith.constant 0 : index
      %65 = vector.load %arg7[%c0_43, %c0_44, %c0_45] : memref<1x8x128xf32, #tpu.memory_space<vmem>>, vector<1x8x128xf32>
      tpu.vector_store %arg7[%c0_43, %c0_44, %c0_45], %64 {strides = array<i32>} : memref<1x8x128xf32, #tpu.memory_space<vmem>>, vector<1x8x128xf32>,
      %cst_46 = arith.constant 0.000000e+00 : f32
      %66 = vector.broadcast %cst_46 : f32 to vector<1x8x128xf32>
      %c0_47 = arith.constant 0 : index
      %c0_48 = arith.constant 0 : index
      %c0_49 = arith.constant 0 : index
      %67 = vector.load %arg8[%c0_47, %c0_48, %c0_49] : memref<1x8x128xf32, #tpu.memory_space<vmem>>, vector<1x8x128xf32>
      tpu.vector_store %arg8[%c0_47, %c0_48, %c0_49], %66 {strides = array<i32>} : memref<1x8x128xf32, #tpu.memory_space<vmem>>, vector<1x8x128xf32>,
    } else {
    }
    %c0 = arith.constant 0 : index
    %c0_1 = arith.constant 0 : index
    %c0_2 = arith.constant 0 : index
    %c0_3 = arith.constant 0 : index
    %3 = vector.load %arg2[%c0, %c0_1, %c0_2, %c0_3] : memref<1x10x7x256xf32, #tpu.memory_space<vmem>>, vector<1x10x7x256xf32>
    %4 = vector.shape_cast %3 : vector<1x10x7x256xf32> to vector<10x7x256xf32>
    %c0_4 = arith.constant 0 : index
    %c0_5 = arith.constant 0 : index
    %c0_6 = arith.constant 0 : index
    %c0_7 = arith.constant 0 : index
    %5 = vector.load %arg3[%c0_4, %c0_5, %c0_6, %c0_7] : memref<1x10x7x256xf32, #tpu.memory_space<vmem>>, vector<1x10x7x256xf32>
    %6 = vector.shape_cast %5 : vector<1x10x7x256xf32> to vector<10x7x256xf32>
    %c0_8 = arith.constant 0 : index
    %c0_9 = arith.constant 0 : index
    %c0_10 = arith.constant 0 : index
    %7 = vector.load %arg4[%c0_8, %c0_9, %c0_10] : memref<1x10x256xf32, #tpu.memory_space<vmem>>, vector<1x10x256xf32>
    %8 = vector.shape_cast %7 : vector<1x10x256xf32> to vector<10x256xf32>
    %c0_11 = arith.constant 0 : index
    %c0_12 = arith.constant 0 : index
    %c0_13 = arith.constant 0 : index
    %9 = vector.load %arg5[%c0_11, %c0_12, %c0_13] : memref<1x10x256xf32, #tpu.memory_space<vmem>>, vector<1x10x256xf32>
    %10 = vector.shape_cast %9 : vector<1x10x256xf32> to vector<10x256xf32>
    %c0_14 = arith.constant 0 : index
    %c0_15 = arith.constant 0 : index
    %c0_16 = arith.constant 0 : index
    %11 = vector.load %arg6[%c0_14, %c0_15, %c0_16] : memref<1x10x256xf32, #tpu.memory_space<vmem>>, vector<1x10x256xf32>
    %12 = vector.shape_cast %11 : vector<1x10x256xf32> to vector<10x256xf32>
    %13 = arith.subf %4, %6 : vector<10x7x256xf32>
    %14 = math.absf %13 : vector<10x7x256xf32>
    %cst = arith.constant 1.000000e+00 : f32
    %15 = vector.broadcast %cst : f32 to vector<10x7x256xf32>
    %16 = arith.cmpf olt, %14, %15 : vector<10x7x256xf32>
    %cst_17 = arith.constant 5.000000e-01 : f32
    %17 = vector.broadcast %cst_17 : f32 to vector<10x7x256xf32>
    %18 = arith.mulf %17, %14 : vector<10x7x256xf32>
    %19 = arith.mulf %18, %14 : vector<10x7x256xf32>
    %cst_18 = arith.constant 5.000000e-01 : f32
    %20 = vector.broadcast %cst_18 : f32 to vector<10x7x256xf32>
    %21 = arith.subf %14, %20 : vector<10x7x256xf32>
    %22 = arith.select %16, %19, %21 : vector<10x7x256xi1>, vector<10x7x256xf32>
    %c0_19 = arith.constant 0 : index
    %c0_20 = arith.constant 0 : index
    %c0_21 = arith.constant 0 : index
    %23 = vector.load %arg7[%c0_19, %c0_20, %c0_21] : memref<1x8x128xf32, #tpu.memory_space<vmem>>, vector<1x8x128xf32>
    %24 = vector.shape_cast %8 : vector<10x256xf32> to vector<10x1x256xf32>
    %25 = vector.broadcast %24 : vector<10x1x256xf32> to vector<10x7x256xf32>
    %26 = arith.mulf %25, %22 : vector<10x7x256xf32>
    %27 = vector.shape_cast %26 : vector<10x7x256xf32> to vector<1x10x7x256xf32>
    %cst_22 = arith.constant dense<0.000000e+00> : vector<1xf32>
    %28 = vector.multi_reduction <add>, %27, %cst_22 [1, 2, 3] : vector<1x10x7x256xf32> to vector<1xf32>
    %29 = vector.shape_cast %28 : vector<1xf32> to vector<1x1x1x1xf32>
    %30 = vector.extract %29[0, 0, 0, 0] : f32 from vector<1x1x1x1xf32>
    %31 = vector.broadcast %30 : f32 to vector<1x8x128xf32>
    %32 = arith.addf %23, %31 : vector<1x8x128xf32>
    %c0_23 = arith.constant 0 : index
    %c0_24 = arith.constant 0 : index
    %c0_25 = arith.constant 0 : index
    %33 = vector.load %arg7[%c0_23, %c0_24, %c0_25] : memref<1x8x128xf32, #tpu.memory_space<vmem>>, vector<1x8x128xf32>
    tpu.vector_store %arg7[%c0_23, %c0_24, %c0_25], %32 {strides = array<i32>} : memref<1x8x128xf32, #tpu.memory_space<vmem>>, vector<1x8x128xf32>,
    %34 = arith.negf %12 : vector<10x256xf32>
    %35 = math.exp %34 : vector<10x256xf32>
    %cst_26 = arith.constant 1.000000e+00 : f32
    %36 = vector.broadcast %cst_26 : f32 to vector<10x256xf32>
    %37 = arith.addf %36, %35 : vector<10x256xf32>
    %38 = arith.divf %36, %37 : vector<10x256xf32>
    %c0_27 = arith.constant 0 : index
    %c0_28 = arith.constant 0 : index
    %c0_29 = arith.constant 0 : index
    %39 = vector.load %arg8[%c0_27, %c0_28, %c0_29] : memref<1x8x128xf32, #tpu.memory_space<vmem>>, vector<1x8x128xf32>
    %cst_30 = arith.constant 0.000000e+00 : f32
    %40 = vector.broadcast %cst_30 : f32 to vector<10x256xf32>
    %41 = arith.subf %40, %8 : vector<10x256xf32>
    %cst_31 = arith.constant 9.99999997E-7 : f32
    %42 = vector.broadcast %cst_31 : f32 to vector<10x256xf32>
    %43 = arith.addf %38, %42 : vector<10x256xf32>
    %44 = math.log %43 : vector<10x256xf32>
    %45 = arith.mulf %41, %44 : vector<10x256xf32>
    %46 = vector.shape_cast %45 : vector<10x256xf32> to vector<1x10x256xf32>
    %cst_32 = arith.constant dense<0.000000e+00> : vector<1xf32>
    %47 = vector.multi_reduction <add>, %46, %cst_32 [1, 2] : vector<1x10x256xf32> to vector<1xf32>
    %48 = vector.shape_cast %47 : vector<1xf32> to vector<1x1x1xf32>
    %49 = vector.extract %48[0, 0, 0] : f32 from vector<1x1x1xf32>
    %50 = vector.broadcast %49 : f32 to vector<1x8x128xf32>
    %51 = arith.addf %39, %50 : vector<1x8x128xf32>
    %c0_33 = arith.constant 0 : index
    %c0_34 = arith.constant 0 : index
    %c0_35 = arith.constant 0 : index
    %52 = vector.load %arg8[%c0_33, %c0_34, %c0_35] : memref<1x8x128xf32, #tpu.memory_space<vmem>>, vector<1x8x128xf32>
    tpu.vector_store %arg8[%c0_33, %c0_34, %c0_35], %51 {strides = array<i32>} : memref<1x8x128xf32, #tpu.memory_space<vmem>>, vector<1x8x128xf32>,
    %cst_36 = arith.constant 1.000000e+00 : f32
    %53 = vector.broadcast %cst_36 : f32 to vector<10x256xf32>
    %54 = arith.subf %53, %38 : vector<10x256xf32>
    %cst_37 = arith.constant 9.99999997E-7 : f32
    %55 = vector.broadcast %cst_37 : f32 to vector<10x256xf32>
    %56 = arith.addf %54, %55 : vector<10x256xf32>
    %57 = math.log %56 : vector<10x256xf32>
    %cst_38 = arith.constant 0.000000e+00 : f32
    %58 = vector.broadcast %cst_38 : f32 to vector<10x256xf32>
    %59 = arith.subf %58, %10 : vector<10x256xf32>
    %60 = arith.mulf %59, %57 : vector<10x256xf32>
    %c0_39 = arith.constant 0 : index
    %c0_40 = arith.constant 0 : index
    %c0_41 = arith.constant 0 : index
    %61 = vector.load %arg9[%c0_39, %c0_40, %c0_41] : memref<1x10x256xf32, #tpu.memory_space<vmem>>, vector<1x10x256xf32>
    %62 = vector.shape_cast %61 : vector<1x10x256xf32> to vector<10x256xf32>
    %63 = vector.shape_cast %60 : vector<10x256xf32> to vector<1x10x256xf32>
    tpu.vector_store %arg9[%c0_39, %c0_40, %c0_41], %63 {strides = array<i32>} : memref<1x10x256xf32, #tpu.memory_space<vmem>>, vector<1x10x256xf32>,
    return
  }
  func.func @transform_0(%arg0: i32, %arg1: i32) -> (i32, i32, i32, i32) {
    %c0_i32 = arith.constant 0 : i32
    %c0_i32_0 = arith.constant 0 : i32
    %c0_i32_1 = arith.constant 0 : i32
    return %arg0, %c0_i32, %c0_i32_0, %arg1 : i32, i32, i32, i32
  }
  func.func @transform_1(%arg0: i32, %arg1: i32) -> (i32, i32, i32, i32) {
    %c0_i32 = arith.constant 0 : i32
    %c0_i32_0 = arith.constant 0 : i32
    %c0_i32_1 = arith.constant 0 : i32
    return %arg0, %c0_i32, %c0_i32_0, %arg1 : i32, i32, i32, i32
  }
  func.func @transform_2(%arg0: i32, %arg1: i32) -> (i32, i32, i32) {
    %c0_i32 = arith.constant 0 : i32
    %c0_i32_0 = arith.constant 0 : i32
    return %arg0, %c0_i32, %arg1 : i32, i32, i32
  }
  func.func @transform_3(%arg0: i32, %arg1: i32) -> (i32, i32, i32) {
    %c0_i32 = arith.constant 0 : i32
    %c0_i32_0 = arith.constant 0 : i32
    return %arg0, %c0_i32, %arg1 : i32, i32, i32
  }
  func.func @transform_4(%arg0: i32, %arg1: i32) -> (i32, i32, i32) {
    %c0_i32 = arith.constant 0 : i32
    %c0_i32_0 = arith.constant 0 : i32
    return %arg0, %c0_i32, %arg1 : i32, i32, i32
  }
  func.func @transform_5(%arg0: i32, %arg1: i32) -> (i32, i32, i32) {
    %c0_i32 = arith.constant 0 : i32
    %c0_i32_0 = arith.constant 0 : i32
    %c0_i32_1 = arith.constant 0 : i32
    return %arg0, %c0_i32, %c0_i32_0 : i32, i32, i32
  }
  func.func @transform_6(%arg0: i32, %arg1: i32) -> (i32, i32, i32) {
    %c0_i32 = arith.constant 0 : i32
    %c0_i32_0 = arith.constant 0 : i32
    %c0_i32_1 = arith.constant 0 : i32
    return %arg0, %c0_i32, %c0_i32_0 : i32, i32, i32
  }
  func.func @transform_7(%arg0: i32, %arg1: i32) -> (i32, i32, i32) {
    %c0_i32 = arith.constant 0 : i32
    %c0_i32_0 = arith.constant 0 : i32
    return %arg0, %c0_i32, %arg1 : i32, i32, i32
  }
}

</mosaic_0001>

<bundles_post_ra>
// kernel: tpu_custom_call.1
= control target key start
LH: loop header
LB: loop body
LE: loop exit
PB: predicated region body
PF: predicated region fallthrough
CT: control target
= control target key end

     0   :  { %s2171_s0 = inlined_call_operand.vmem [shape: f32[2,10,7,256], index: 0, kind: input, shape index: {}]   ;;  %s2172_s1 = inlined_call_operand.vmem [shape: f32[2,10,7,256], index: 1, kind: input, shape index: {}]   ;;  %s2173_s2 = inlined_call_operand.vmem [shape: f32[2,10,256], index: 2, kind: input, shape index: {}]   ;;  %s2174_s3 = inlined_call_operand.vmem [shape: f32[2,10,256], index: 3, kind: input, shape index: {}]   ;;  %s2175_s4 = inlined_call_operand.vmem [shape: f32[2,10,256], index: 4, kind: input, shape index: {}]   ;;  %s2176_s5 = inlined_call_operand.hbm [shape: f32[2,8,128], index: 5, kind: output, shape index: {0}]   ;;  %s2177_s6 = inlined_call_operand.hbm [shape: f32[2,8,128], index: 6, kind: output, shape index: {1}]   ;;  %s2178_s7 = inlined_call_operand.vmem [shape: f32[2,10,256], index: 7, kind: output, shape index: {2}]  }
   0x1   :  { %2181 = sst [smem:[#allocation8_spill]] %s2171_s0 }
   0x2   :  { %2182 = sst [smem:[#allocation9_spill]] %s2172_s1 }
   0x3   :  { %13 = vsyncpa [#allocation3], 0 }
   0x4   :  { %15 = vsyncpa [#allocation3 + $0x1], 0 }
   0x5   :  { %16 = vsyncpa [#allocation5], 0 }
   0x6   :  { %18 = vsyncpa [#allocation5 + $0x1], 0  ;;  %s1585_s24 = smov 0   ;;  %s1587_s25 = smov 0  }
   0x7   :  { %s1589_s26 = smov 0   ;;  %s1591_s27 = smov 0  }
   0x8   :  { %s1593_s28 = smov 0   ;;  %s1595_s29 = smov 0  }
   0x9 LB: > { %s1281_s30 = sadd.s32 4294967295, %s1540_s29   ;;  %s1282_s8 = sadd.s32 4294967294, %s1540_s29   ;;  %s1540_s29 = sphi %s1595_s29, %s24_s29   ;;  %s1536_s28 = sphi %s1593_s28, %s2196_s28   ;;  %s1532_s27 = sphi %s1591_s27, %s2195_s27   ;;  %s1528_s26 = sphi %s1589_s26, %s2194_s26   ;;  %s1524_s25 = sphi %s1587_s25, %s2193_s25   ;;  %s1520_s24 = sphi %s1585_s24, %s2192_s24  }
   0xa   : > { %s36_s9 = sadd.s32 1, %s1536_s28  ;;  %s183_s10 = sadd.s32 1, %s1528_s26 }
   0xb   : > { %p38_p0 = scmp.ge.s32.totalorder %s36_s9, 2  ;;  %p193_p1 = scmp.ne.s32.totalorder %s1528_s26, %s1524_s25 }
   0xc   : > { %p194_p2 = scmp.eq.s32.totalorder %s1281_s30, 1  ;;  %p199_p3 = scmp.ne.s32.totalorder %s1524_s25, %s1520_s24 }
   0xd   : > { %s2198_s9 = smov (%p38_p0, %s36_s9), 0  ;;  %p200_p5 = scmp.eq.s32.totalorder %s1282_s8, 1 }
   0xe   : > { %p1625_p4 = por %p194_p2, %p193_p1  ;;  %s180_s12 = ssub.s32 %s1536_s28, %s2198_s9 }
   0xf   : > { %p1285_p6 = scmp.ge.s32.totalorder %s1540_s29, 1  ;;  %p181_p7 = scmp.eq.s32.totalorder %s180_s12, 0 }
  0x10   : > { %p1632_p8 = por %p200_p5, %p199_p3  ;;  %p337_p9 = scmp.lt.s32.totalorder %s1540_s29, 3 }
  0x11   : > { %s1638_s14 = scalar_select %p181_p7, %s1528_s26, %s183_s10  }
  0x12   : > { %p338_p10 = pnand %p1285_p6, %p337_p9 }
  0x13   : > { %p424_p11 = scmp.lt.s32.totalorder (!%p338_p10), %s1532_s27, 1  ;;  %s2185_s0 = sld [smem:[#allocation8_spill]] (!%p338_p10) }
  0x14   : > { %341 = sbr.rel (%p338_p10) target bundleno = 345 (0x159), region = 40  ;;  %s2186_s1 = sld [smem:[#allocation9_spill]] (!%p338_p10) }
  0x15   : > { %s2180_s8 = sshll.u32 (!%p338_p10), %s1532_s27, 7  ;;  %s1543_s22 = smov (!%p338_p10), [#allocation2]  }
  0x19   : > { %s425_s15 = scalar_select %p424_p11, %s1532_s27, 1  ;;  %v1542_v0 = vmov 1966171168   ;;  %v691_v2 = vlaneseq  ;;  %vm879_vm1 = vcmask 1046528  }
  0x1a   : > { %v689_v1 = vunpack.c.l.s4 %v1542_v0 }
  0x1b   : > { %s1642_s16 = sshll.u32 %s425_s15, 5  ;;  %v692_v4 = vshrl.u32 %v691_v2, 7  ;;  %s1332_s20 = smul.u32 160, %s425_s15 }
  0x1c   : > { %s1648_s19 = scalar_lea.vmem %s2173_s2, %s1642_s16  ;;  %v690_v3 = vunpack.c.0.s8 %v689_v1  ;;  %s1951_s17 = scalar_lea.vmem %s2175_s4, %s1642_s16 }
  0x1d   : > { %v1651_v5 = vld [vmem:[%s1648_s19] sm:$0xff]  ;;  %v1654_v6 = vld [vmem:[%s1648_s19 + $0x8] sm:$0xff]  ;;  %s1666_s23 = scalar_lea.vmem %s2185_s0, %s1332_s20  ;;  %s1672_s10 = scalar_lea.vmem %s2186_s1, %s1332_s20  ;;  %v1677_v15 = vsub.s32 0, %v692_v4  ;;  %v1679_v16 = vsub.s32 1, %v692_v4  ;;  %v1770_v46 = vld [vmem:[%s1648_s19 + $0x10] sm:$0x3] }
  0x1e   : > { %v686_v7 = vcombine.low %v1651_v5, %v1654_v6  ;;  %v1658_v8 = vsub.s32 %v690_v3, %v692_v4  ;;  %v687_v9 = vcombine.high %v1651_v5, %v1654_v6  ;;  %v1675_v12 = vld [vmem:[%s1666_s23] sm:$0x7f]  ;;  %v1682_v17 = vld [vmem:[%s1666_s23 + $0x8] sm:$0x7f]  ;;  %v1685_v18 = vld [vmem:[%s1666_s23 + $0x10] sm:$0x7f]  ;;  %s461_s20 = scalar_lea.vmem %s2174_s3, %s1642_s16 }
  0x1f   : > { %v1688_v19 = vld [vmem:[%s1666_s23 + $0x18] sm:$0x7f]  ;;  %v1694_v21 = vld [vmem:[%s1666_s23 + $0x20] sm:$0x7f]  ;;  %v1697_v22 = vld [vmem:[%s1666_s23 + $0x28] sm:$0x7f] }
  0x20   : > { %v694_v10 = vrot.slane %v686_v7, %v1658_v8  ;;  %v701_v11 = vrot.slane %v687_v9, %v1658_v8  ;;  %v1700_v23 = vld [vmem:[%s1666_s23 + $0x30] sm:$0x7f]  ;;  %v1703_v24 = vld [vmem:[%s1672_s10] sm:$0x7f]  ;;  %v1709_v26 = vld [vmem:[%s1666_s23 + $0x38] sm:$0x7f] }
  0x21   : > { %v1712_v27 = vld [vmem:[%s1666_s23 + $0x40] sm:$0x7f]  ;;  %v1715_v28 = vld [vmem:[%s1666_s23 + $0x48] sm:$0x7f]  ;;  %v1721_v30 = vld [vmem:[%s1672_s10 + $0x10] sm:$0x7f]  ;;  %v541_v47 = vsub.f32 %v1675_v12, %v1703_v24 }
  0x22   : > { %v702_v13 = vcombine.high %v694_v10, %v694_v10  ;;  %v703_v14 = vcombine.high %v701_v11, %v701_v11  ;;  %v1691_v20 = vrot.slane %v694_v10, %v1658_v8  ;;  %v1706_v25 = vrot.slane %v701_v11, %v1658_v8  ;;  %v1718_v29 = vld [vmem:[%s1672_s10 + $0x8] sm:$0x7f]  ;;  %v1724_v31 = vld [vmem:[%s1672_s10 + $0x18] sm:$0x7f]  ;;  %v1727_v32 = vld [vmem:[%s1666_s23 + $0x50] sm:$0x7f] }
  0x23   : > { %v1730_v33 = vld [vmem:[%s1666_s23 + $0x58] sm:$0x7f]  ;;  %v1733_v34 = vld [vmem:[%s1666_s23 + $0x60] sm:$0x7f]  ;;  %v1739_v36 = vld [vmem:[%s1672_s10 + $0x28] sm:$0x7f]  ;;  %v542_v57 = vsub.f32 %v1682_v17, %v1718_v29  ;;  %v543_v58 = vsub.f32 %v1685_v18, %v1721_v30  ;;  %v544_v59 = vsub.f32 %v1688_v19, %v1724_v31 }
  0x24   : > { %v1736_v35 = vld [vmem:[%s1672_s10 + $0x20] sm:$0x7f]  ;;  %v1742_v37 = vld [vmem:[%s1672_s10 + $0x30] sm:$0x7f]  ;;  %v1745_v38 = vrot.slane %v702_v13, %v1658_v8  ;;  %v1748_v39 = vrot.slane %v703_v14, %v1658_v8  ;;  %v1752_v40 = vcombine.high %v1691_v20, %v1691_v20  ;;  %v1755_v41 = vld [vmem:[%s1666_s23 + $0x68] sm:$0x7f]  ;;  %v1776_v48 = vcombine.high %v1706_v25, %v1706_v25 }
  0x25   : > { %v1758_v42 = vld [vmem:[%s1666_s23 + $0x70] sm:$0x7f]  ;;  %v1761_v43 = vld [vmem:[%s1672_s10 + $0x38] sm:$0x7f]  ;;  %v1764_v44 = vld [vmem:[%s1672_s10 + $0x40] sm:$0x7f]  ;;  %v762_v49 = vrot.slane %v1691_v20, %v1677_v15  ;;  %v766_v50 = vrot.slane %v1691_v20, %v1679_v16  ;;  %v794_v60 = vrot.slane %v1706_v25, %v1677_v15  ;;  %v545_v1 = vsub.f32 %v1694_v21, %v1736_v35 }
  0x26   : > { %v1767_v45 = vld [vmem:[%s1672_s10 + $0x48] sm:$0x7f]  ;;  %v1783_v51 = vld [vmem:[%s1666_s23 + $0x78] sm:$0x7f]  ;;  %v1786_v52 = vld [vmem:[%s1666_s23 + $0x80] sm:$0x7f]  ;;  %v546_v2 = vsub.f32 %v1697_v22, %v1739_v36  ;;  %v547_v3 = vsub.f32 %v1700_v23, %v1742_v37  ;;  %v1818_v4 = vcombine.high %v1745_v38, %v1745_v38  ;;  %v548_v11 = vsub.f32 %v1709_v26, %v1761_v43 }
  0x27   : > { %v1789_v53 = vld [vmem:[%s1666_s23 + $0x88] sm:$0x7f]  ;;  %v519_v54 = vld [vmem:[%s1672_s10 + $0x50] sm:$0x7f]  ;;  %v520_v55 = vld [vmem:[%s1672_s10 + $0x58] sm:$0x7f]  ;;  %v549_v12 = vsub.f32 %v1712_v27, %v1764_v44  ;;  %v550_v13 = vsub.f32 %v1715_v28, %v1767_v45  ;;  %v1831_v14 = vcombine.high %v1748_v39, %v1748_v39  ;;  %v770_v24 = vrot.slane %v1745_v38, %v1677_v15 }
  0x28   : > { %v521_v56 = vld [vmem:[%s1672_s10 + $0x60] sm:$0x7f]  ;;  %v1803_v61 = vld [vmem:[%s1666_s23 + $0x90] sm:$0x7f]  ;;  %v522_v62 = vld [vmem:[%s1672_s10 + $0x68] sm:$0x7f]  ;;  %v551_v21 = vsub.f32 %v1727_v32, %v519_v54  ;;  %v552_v22 = vsub.f32 %v1730_v33, %v520_v55  ;;  %v774_v29 = vrot.slane %v1745_v38, %v1679_v16  ;;  %v778_v33 = vrot.slane %v1752_v40, %v1677_v15 }
  0x29   : > { %v523_v63 = vld [vmem:[%s1672_s10 + $0x70] sm:$0x7f]  ;;  %v1808_v0 = vld [vmem:[%s1648_s19 + $0x18] sm:$0x3]  ;;  %v525_v9 = vld [vmem:[%s1672_s10 + $0x80] sm:$0x7f]  ;;  %v553_v23 = vsub.f32 %v1733_v34, %v521_v56  ;;  %v554_v26 = vsub.f32 %v1755_v41, %v522_v62  ;;  %v782_v36 = vrot.slane %v1752_v40, %v1679_v16  ;;  %v786_v37 = vrot.slane %v1818_v4, %v1677_v15  ;;  %s1048_s19 = scalar_lea.hbm %s2176_s5, %s2180_s8 }
  0x2a   : > { %v524_v7 = vld [vmem:[%s1672_s10 + $0x78] sm:$0x7f]  ;;  %v526_v10 = vld [vmem:[%s1672_s10 + $0x88] sm:$0x7f]  ;;  %v527_v18 = vld [vmem:[%s1672_s10 + $0x90] sm:$0x7f]  ;;  %v555_v27 = vsub.f32 %v1758_v42, %v523_v63  ;;  %v736_v28 = vcombine.low %v1770_v46, %v1808_v0  ;;  %v557_v31 = vsub.f32 %v1786_v52, %v525_v9  ;;  %v790_v42 = vrot.slane %v1818_v4, %v1679_v16 }
  0x2b   : > { %v508_v17 = vld [vmem:[%s1666_s23 + $0x98] sm:$0x7f]  ;;  %v556_v30 = vsub.f32 %v1783_v51, %v524_v7  ;;  %v558_v32 = vsub.f32 %v1789_v53, %v526_v10  ;;  %v559_v34 = vsub.f32 %v1803_v61, %v527_v18  ;;  %v561_v41 = vand.u32 2147483647, %v541_v47  ;;  %s481_s23 = scalar_lea.vmem %s2178_s7, %s1642_s16  ;;  %s2105_s16 = sand.u32 1, %s1524_s25  }
  0x2c   : > { %v528_v19 = vld [vmem:[%s1672_s10 + $0x98] sm:$0x7f]  ;;  %v798_v43 = vrot.slane %v1706_v25, %v1679_v16  ;;  %v802_v44 = vrot.slane %v1748_v39, %v1677_v15  ;;  %v562_v45 = vand.u32 2147483647, %v542_v57  ;;  %v563_v51 = vand.u32 2147483647, %v543_v58 }
  0x2d   : > { %v560_v35 = vsub.f32 %v508_v17, %v528_v19  ;;  %v564_v52 = vand.u32 2147483647, %v544_v59  ;;  %v743_v53 = vrot.slane %v736_v28, %v1658_v8  ;;  %v1864_v54 = vand.u32 2147483647, %v545_v1  ;;  %s2179_s30 = sshll.u32 %s2105_s16, 3 }
  0x2e   : > { %v1866_v55 = vand.u32 2147483647, %v546_v2  ;;  %v1868_v56 = vand.u32 2147483647, %v547_v3  ;;  %v1872_v61 = vand.u32 2147483647, %v548_v11 }
  0x2f   : > { %v1874_v62 = vand.u32 2147483647, %v549_v12  ;;  %v1876_v63 = vand.u32 2147483647, %v550_v13  ;;  %v744_v57 = vcombine.high %v743_v53, %v743_v53  ;;  %v1878_v58 = vand.u32 2147483647, %v551_v21 }
  0x30   : > { %v1880_v59 = vand.u32 2147483647, %v552_v22  ;;  %v601_v1 = vmul.f32 0.5, %v561_v41  ;;  %v1884_v3 = vand.u32 2147483647, %v553_v23  ;;  %v602_v9 = vmul.f32 0.5, %v562_v45 }
  0x31   : > { %v1886_v7 = vand.u32 2147483647, %v554_v26  ;;  %v603_v10 = vmul.f32 0.5, %v563_v51  ;;  %v1888_v11 = vand.u32 2147483647, %v555_v27  ;;  %v1895_v17 = vrot.slane %v743_v53, %v1658_v8  ;;  %s404_s10 = scalar_lea.vmem [#allocation2], %s2179_s30 }
  0x32   : > { %v1890_v12 = vand.u32 2147483647, %v556_v30  ;;  %v1892_v13 = vand.u32 2147483647, %v557_v31  ;;  %v1897_v18 = vand.u32 2147483647, %v558_v32  ;;  %v1902_v22 = vrot.slane %v744_v57, %v1658_v8 }
  0x33   : > { %v1899_v19 = vand.u32 2147483647, %v559_v34  ;;  %v604_v21 = vmul.f32 0.5, %v564_v52  ;;  %vm581_vm0 = vcmp.lt.f32.partialorder %v561_v41, 1.0  ;;  %v605_v23 = vmul.f32 0.5, %v1864_v54  ;;  %s1050_s12 = sshll.u32 %s404_s10, 4  ;;  %s1051_s12 = int_to_ptr.vmem [resolvable:$true] %s1050_s12 }
  0x34   : > { %v621_v26 = vmul.f32 %v601_v1, %v561_v41  ;;  %v1298_v27 = vadd.f32 -0.5, %v561_v41  ;;  %v622_v28 = vmul.f32 %v602_v9, %v562_v45  ;;  %v623_v30 = vmul.f32 %v603_v10, %v563_v51  ;;  %s1434_s21 = scalar_lea.vmem %s1051_s12, 128 }
  0x35   : > { %v1299_v31 = vadd.f32 -0.5, %v562_v45  ;;  %v1300_v2 = vadd.f32 -0.5, %v563_v51  ;;  %v1905_v53 = vand.u32 2147483647, %v560_v35  ;;  %vm582_vm2 = vcmp.lt.f32.partialorder %v562_v45, 1.0  ;;  %p1435_p12 = scmp.ne.s32.totalorder %s1051_s12, %s1434_s21 }
  0x36   : > { %vm583_vm3 = vcmp.lt.f32.partialorder %v563_v51, 1.0  ;;  %vm584_vm4 = vcmp.lt.f32.partialorder %v564_v52, 1.0  ;;  %v606_v8 = vmul.f32 0.5, %v1866_v55  ;;  %v624_v34 = vmul.f32 %v604_v21, %v564_v52 }
  0x37   : > { %v1301_v57 = vadd.f32 -0.5, %v564_v52  ;;  %vm585_vm5 = vcmp.lt.f32.partialorder %v1864_v54, 1.0  ;;  %vm586_vm6 = vcmp.lt.f32.partialorder %v1866_v55, 1.0  ;;  %v607_v1 = vmul.f32 0.5, %v1868_v56  ;;  %p1436_p13 = pnand %p1435_p12, %p1625_p4 }
  0x38   : > { %v661_v9 = vsel %vm581_vm0, %v621_v26, %v1298_v27  ;;  %v625_v35 = vmul.f32 %v605_v23, %v1864_v54  ;;  %v1302_v45 = vadd.f32 -0.5, %v1864_v54  ;;  %v662_v51 = vsel %vm582_vm2, %v622_v28, %v1299_v31 }
  0x39   : > { %v663_v10 = vsel %vm583_vm3, %v623_v30, %v1300_v2  ;;  %vm587_vm7 = vcmp.lt.f32.partialorder %v1868_v56, 1.0  ;;  %vm588_vm8 = vcmp.lt.f32.partialorder %v1872_v61, 1.0  ;;  %vm589_vm9 = vcmp.lt.f32.partialorder %v1874_v62, 1.0  ;;  %p1437_p0 = pneg %p1436_p13 }
  0x3a   : > { %v608_v21 = vmul.f32 0.5, %v1872_v61  ;;  %v626_v32 = vmul.f32 %v606_v8, %v1866_v55  ;;  %v1303_v47 = vadd.f32 -0.5, %v1866_v55  ;;  %v664_v41 = vsel %vm584_vm4, %v624_v34, %v1301_v57 }
  0x3b   : > { %v859_v23 = vmul.f32 %v762_v49, %v661_v9  ;;  %vm590_vm10 = vcmp.lt.f32.partialorder %v1876_v63, 1.0  ;;  %v609_v2 = vmul.f32 0.5, %v1874_v62  ;;  %v610_v26 = vmul.f32 0.5, %v1876_v63 }
  0x3c   : > { %v860_v27 = vmul.f32 %v766_v50, %v662_v51  ;;  %v861_v52 = vmul.f32 %v770_v24, %v663_v10  ;;  %v611_v28 = vmul.f32 0.5, %v1878_v58  ;;  %v627_v30 = vmul.f32 %v607_v1, %v1868_v56  ;;  %v537_v51 = vld [vmem:[%s1951_s17] sm:$0xff]  ;;  %v538_v10 = vld [vmem:[%s1951_s17 + $0x8] sm:$0xff] }
  0x3d   : > { %v1304_v49 = vadd.f32 -0.5, %v1868_v56  ;;  %v665_v31 = vsel %vm585_vm5, %v625_v35, %v1302_v45  ;;  %vm591_vm11 = vcmp.lt.f32.partialorder %v1878_v58, 1.0  ;;  %v612_v8 = vmul.f32 0.5, %v1880_v59 }
  0x3e   : > { %v613_v20 = vmul.f32 0.5, %v1884_v3  ;;  %v614_v50 = vmul.f32 0.5, %v1886_v7  ;;  %v862_v24 = vmul.f32 %v774_v29, %v664_v41  ;;  %v628_v54 = vmul.f32 %v608_v21, %v1872_v61 }
  0x3f   : > { %v1305_v34 = vadd.f32 -0.5, %v1872_v61  ;;  %v666_v57 = vsel %vm586_vm6, %v626_v32, %v1303_v47  ;;  %v880_v1 = vsel %vm879_vm1, %v859_v23, 0.0  ;;  %vm592_vm12 = vcmp.lt.f32.partialorder %v1880_v59, 1.0 }
  0x40   : > { %v615_v38 = vmul.f32 0.5, %v1888_v11  ;;  %v863_v29 = vmul.f32 %v778_v33, %v665_v31  ;;  %v881_v9 = vsel %vm879_vm1, %v860_v27, 0.0  ;;  %v883_v35 = vsel %vm879_vm1, %v861_v52, 0.0  ;;  %v540_v31 = vld [vmem:[%s1951_s17 + $0x18] sm:$0x3] }
  0x41   : > { %v629_v45 = vmul.f32 %v609_v2, %v1874_v62  ;;  %v1306_v55 = vadd.f32 -0.5, %v1874_v62  ;;  %v667_v47 = vsel %vm587_vm7, %v627_v30, %v1304_v49  ;;  %v882_v32 = vadd.f32 %v881_v9, %v880_v1  ;;  %v539_v2 = vld [vmem:[%s1951_s17 + $0x10] sm:$0x3] }
  0x42   : > { %vm593_vm13 = vcmp.lt.f32.partialorder %v1884_v3, 1.0  ;;  %v616_v21 = vmul.f32 0.5, %v1890_v12  ;;  %v630_v33 = vmul.f32 %v610_v26, %v1876_v63  ;;  %v864_v41 = vmul.f32 %v782_v36, %v666_v57 }
  0x43   : > { %v885_v23 = vsel %vm879_vm1, %v862_v24, 0.0  ;;  %v631_v56 = vmul.f32 %v611_v28, %v1878_v58  ;;  %v1307_v27 = vadd.f32 -0.5, %v1876_v63  ;;  %v668_v52 = vsel %vm588_vm8, %v628_v54, %v1305_v34 }
  0x44   : > { %v884_v30 = vadd.f32 %v883_v35, %v882_v32  ;;  %vm594_vm14 = vcmp.lt.f32.partialorder %v1886_v7, 1.0  ;;  %v632_v49 = vmul.f32 %v612_v8, %v1880_v59  ;;  %v1308_v26 = vadd.f32 -0.5, %v1878_v58 }
  0x45   : > { %v865_v40 = vmul.f32 %v786_v37, %v667_v47  ;;  %v887_v36 = vsel %vm879_vm1, %v863_v29, 0.0  ;;  %v669_v28 = vsel %vm589_vm9, %v629_v45, %v1306_v55  ;;  %v1318_v61 = vmul.f32 -1.442695, %v537_v51 }
  0x46   : > { %v886_v24 = vadd.f32 %v885_v23, %v884_v30  ;;  %v1319_v54 = vmul.f32 -1.442695, %v538_v10  ;;  %vm595_vm15 = vcmp.lt.f32.partialorder %v1888_v11, 1.0  ;;  %v1309_v34 = vadd.f32 -0.5, %v1880_v59 }
  0x47   : > { %v866_v8 = vmul.f32 %v790_v42, %v668_v52  ;;  %v889_v57 = vsel %vm879_vm1, %v864_v41, 0.0  ;;  %v1320_v37 = vmul.f32 -1.442695, %v539_v2  ;;  %v670_v1 = vsel %vm590_vm10, %v630_v33, %v1307_v27 }
  0x48   : > { %v888_v29 = vadd.f32 %v887_v36, %v886_v24  ;;  %1402 = vpow2.f32 %v1318_v61  ;;  %v1321_v62 = vmul.f32 -1.442695, %v540_v31  ;;  %vm596_vm0 = vcmp.lt.f32.partialorder %v1890_v12, 1.0 }
  0x49   : > { %v633_v9 = vmul.f32 %v613_v20, %v1884_v3  ;;  %v867_v35 = vmul.f32 %v794_v60, %v669_v28  ;;  %v891_v4 = vsel %vm879_vm1, %v865_v40, 0.0  ;;  %1404 = vpow2.f32 %v1319_v54 }
  0x4a   : > { %v1310_v42 = vadd.f32 -0.5, %v1884_v3  ;;  %v671_v63 = vsel %vm591_vm11, %v631_v56, %v1308_v26  ;;  %v890_v45 = vadd.f32 %v889_v57, %v888_v29  ;;  %1406 = vpow2.f32 %v1320_v37 }
  0x4b   : > { %vm597_vm2 = vcmp.lt.f32.partialorder %v1892_v13, 1.0  ;;  %vm598_vm3 = vcmp.lt.f32.partialorder %v1897_v18, 1.0  ;;  %v617_v20 = vmul.f32 0.5, %v1892_v13  ;;  %v868_v60 = vmul.f32 %v798_v43, %v670_v1 }
  0x4c   : > { %v893_v55 = vsel %vm879_vm1, %v866_v8, 0.0  ;;  %1408 = vpow2.f32 %v1321_v62  ;;  %v634_v47 = vmul.f32 %v614_v50, %v1886_v7  ;;  %v1311_v58 = vadd.f32 -0.5, %v1886_v7 }
  0x4d   : > { %v672_v32 = vsel %vm592_vm12, %v632_v49, %v1309_v34  ;;  %v892_v51 = vadd.f32 %v891_v4, %v890_v45  ;;  %v618_v10 = vmul.f32 0.5, %v1897_v18  ;;  %v619_v33 = vmul.f32 0.5, %v1899_v19 }
  0x4e   : > { %v869_v25 = vmul.f32 %v802_v44, %v671_v63  ;;  %v895_v43 = vsel %vm879_vm1, %v867_v35, 0.0  ;;  %v635_v41 = vmul.f32 %v615_v38, %v1888_v11  ;;  %v1312_v50 = vadd.f32 -0.5, %v1888_v11 }
  0x4f   : > { %v673_v23 = vsel %vm593_vm13, %v633_v9, %v1310_v42  ;;  %v894_v59 = vadd.f32 %v893_v55, %v892_v51  ;;  %vm599_vm4 = vcmp.lt.f32.partialorder %v1899_v19, 1.0  ;;  %v620_v2 = vmul.f32 0.5, %v1905_v53 }
  0x50   : > { %v636_v56 = vmul.f32 %v616_v21, %v1890_v12  ;;  %v2187_v27 = vrot.slane %v1748_v39, %v1679_v16  ;;  %v897_v52 = vsel %vm879_vm1, %v868_v60, 0.0  ;;  %v637_v38 = vmul.f32 %v617_v20, %v1892_v13 }
  0x51   : > { %v1313_v30 = vadd.f32 -0.5, %v1890_v12  ;;  %v674_v3 = vsel %vm594_vm14, %v634_v47, %v1311_v58  ;;  %v896_v49 = vadd.f32 %v895_v43, %v894_v59  ;;  %vm600_vm5 = vcmp.lt.f32.partialorder %v1905_v53, 1.0 }
  0x52   : > { %v870_v44 = vmul.f32 %v2187_v27, %v672_v32  ;;  %v638_v26 = vmul.f32 %v618_v10, %v1897_v18  ;;  %v818_v21 = vrot.slane %v1831_v14, %v1677_v15  ;;  %v2188_v39 = vrot.slane %v1776_v48, %v1677_v15 }
  0x53   : > { %v899_v36 = vsel %vm879_vm1, %v869_v25, 0.0  ;;  %v1314_v31 = vadd.f32 -0.5, %v1892_v13  ;;  %v1315_v28 = vadd.f32 -0.5, %v1897_v18  ;;  %v675_v7 = vsel %vm595_vm15, %v635_v41, %v1312_v50 }
  0x54   : > { %v871_v40 = vmul.f32 %v2188_v39, %v673_v23  ;;  %v898_v24 = vadd.f32 %v897_v52, %v896_v49  ;;  %v639_v61 = vmul.f32 %v619_v33, %v1899_v19  ;;  %v822_v54 = vrot.slane %v1831_v14, %v1679_v16 }
  0x55   : > { %v2189_v34 = vrot.slane %v1776_v48, %v1679_v16  ;;  %v901_v57 = vsel %vm879_vm1, %v870_v44, 0.0  ;;  %v640_v37 = vmul.f32 %v620_v2, %v1905_v53  ;;  %v1316_v1 = vadd.f32 -0.5, %v1899_v19  ;;  %v1403_v62 = vpop.eup %1402 }
  0x56   : > { %v676_v11 = vsel %vm596_vm0, %v636_v56, %v1313_v30  ;;  %v900_v29 = vadd.f32 %v899_v36, %v898_v24  ;;  %v1317_v9 = vadd.f32 -0.5, %v1905_v53  ;;  %v826_v14 = vrot.slane %v1895_v17, %v1677_v15  ;;  %v1405_v4 = vpop.eup %1404 }
  0x57   : > { %v872_v8 = vmul.f32 %v2189_v34, %v674_v3  ;;  %v873_v35 = vmul.f32 %v818_v21, %v675_v7  ;;  %v903_v48 = vsel %vm879_vm1, %v871_v40, 0.0  ;;  %v677_v42 = vsel %vm597_vm2, %v637_v38, %v1314_v31  ;;  %v1407_v20 = vpop.eup %1406 }
  0x58   : > { %v678_v63 = vsel %vm598_vm3, %v638_v26, %v1315_v28  ;;  %v902_v45 = vadd.f32 %v901_v57, %v900_v29  ;;  %v943_v12 = vadd.f32 1.0, %v1403_v62  ;;  %v830_v60 = vrot.slane %v1895_v17, %v1679_v16 }
  0x59   : > { %v874_v55 = vmul.f32 %v822_v54, %v676_v11  ;;  %v905_v47 = vsel %vm879_vm1, %v872_v8, 0.0  ;;  %v944_v58 = vadd.f32 1.0, %v1405_v4  ;;  %v1409_v32 = vpop.eup %1408  ;;  %v834_v51 = vrot.slane %v1902_v22, %v1677_v15  ;;  %v533_v11 = vld [vmem:[%s461_s20] sm:$0xff]  ;;  %v535_v4 = vld [vmem:[%s461_s20 + $0x10] sm:$0x3] }
  0x5a   : > { %v904_v10 = vadd.f32 %v903_v48, %v902_v45  ;;  %v945_v13 = vadd.f32 1.0, %v1407_v20  ;;  %1410 = vrcp.f32 %v943_v12  ;;  %v875_v33 = vmul.f32 %v826_v14, %v677_v42  ;;  %v536_v12 = vld [vmem:[%s461_s20 + $0x18] sm:$0x3] }
  0x5b   : > { %v907_v18 = vsel %vm879_vm1, %v873_v35, 0.0  ;;  %v946_v25 = vadd.f32 1.0, %v1409_v32  ;;  %1412 = vrcp.f32 %v944_v58  ;;  %v679_v43 = vsel %vm599_vm4, %v639_v61, %v1316_v1 }
  0x5c   : > { %v906_v17 = vadd.f32 %v905_v47, %v904_v10  ;;  %1414 = vrcp.f32 %v945_v13  ;;  %v838_v41 = vrot.slane %v1902_v22, %v1679_v16  ;;  %v876_v50 = vmul.f32 %v830_v60, %v678_v63 }
  0x5d   : > { %v909_v23 = vsel %vm879_vm1, %v874_v55, 0.0  ;;  %1416 = vrcp.f32 %v946_v25  ;;  %v680_v15 = vsel %vm600_vm5, %v640_v37, %v1317_v9  ;;  %v877_v2 = vmul.f32 %v834_v51, %v679_v43  ;;  %v534_v9 = vld [vmem:[%s461_s20 + $0x8] sm:$0xff]  ;;  %s1023_s20 = scalar_lea.sflag [#allocation3], %s2105_s16 }
  0x5e   : > { %v908_v59 = vadd.f32 %v907_v18, %v906_v17  ;;  %v911_v56 = vsel %vm879_vm1, %v875_v33, 0.0  ;;  %v878_v44 = vmul.f32 %v838_v41, %v680_v15  ;;  %v913_v19 = vsel %vm879_vm1, %v876_v50, 0.0 }
  0x5f   : > { %v915_v38 = vsel %vm879_vm1, %v877_v2, 0.0  ;;  %v956_v37 = vsub.f32 0.0, %v1651_v5  ;;  %v957_v29 = vsub.f32 0.0, %v1654_v6  ;;  %v958_v14 = vsub.f32 0.0, %v1770_v46 }
  0x60   : > { %v910_v27 = vadd.f32 %v909_v23, %v908_v59  ;;  %v917_v16 = vsel %vm879_vm1, %v878_v44, 0.0  ;;  %v959_v42 = vsub.f32 0.0, %v1808_v0  ;;  %v1010_v20 = vsub.f32 0.0, %v533_v11 }
  0x61   : > { %v1011_v47 = vsub.f32 0.0, %v534_v9  ;;  %vm977_vm1 = vcmask 1041408   ;;  %v1012_v51 = vsub.f32 0.0, %v535_v4  ;;  %v1013_v0 = vsub.f32 0.0, %v536_v12 }
  0x62   : > { %v912_v52 = vadd.f32 %v911_v56, %v910_v27 }
  0x64   : > { %v914_v30 = vadd.f32 %v913_v19, %v912_v52 }
  0x66   : > { %v916_v22 = vadd.f32 %v915_v38, %v914_v30 }
  0x67   : > { %v1411_v3 = vpop.eup %1410 }
  0x68   : > { %v1413_v49 = vpop.eup %1412  ;;  %v918_v26 = vadd.f32 %v917_v16, %v916_v22  ;;  %v960_v53 = vadd.f32 1e-06, %v1411_v3  ;;  %v994_v21 = vsub.f32 1.0, %v1411_v3 }
  0x69   : > { %v1415_v39 = vpop.eup %1414  ;;  %v961_v40 = vadd.f32 1e-06, %v1413_v49  ;;  %v995_v36 = vsub.f32 1.0, %v1413_v49 }
  0x6a   : > { %v1417_v31 = vpop.eup %1416  ;;  %919 = vadd.xlane.f32.xlu0 %v918_v26  ;;  %v962_v28 = vadd.f32 1e-06, %v1415_v39  ;;  %1418 = vlog2.f32 %v960_v53  ;;  %v996_v7 = vsub.f32 1.0, %v1415_v39  ;;  %v998_v24 = vadd.f32 1e-06, %v994_v21 }
  0x6b   : > { %v963_v61 = vadd.f32 1e-06, %v1417_v31  ;;  %1420 = vlog2.f32 %v961_v40  ;;  %v997_v54 = vsub.f32 1.0, %v1417_v31  ;;  %v999_v34 = vadd.f32 1e-06, %v995_v36 }
  0x6c   : > { %1422 = vlog2.f32 %v962_v28  ;;  %v1000_v8 = vadd.f32 1e-06, %v996_v7 }
  0x6d   : > { %1424 = vlog2.f32 %v963_v61  ;;  %v1001_v57 = vadd.f32 1e-06, %v997_v54 }
  0x6e   : > { %1426 = vlog2.f32 %v998_v24 }
  0x6f   : > { %1428 = vlog2.f32 %v999_v34 }
  0x70   : > { %1430 = vlog2.f32 %v1000_v8 }
  0x71   : > { %1432 = vlog2.f32 %v1001_v57 }
  0x77   : > { %v1419_v1 = vpop.eup %1418 }
  0x78   : > { %v1421_v62 = vpop.eup %1420  ;;  %v965_v35 = vmul.f32 0.6931472, %v1419_v1 }
  0x79   : > { %v1423_v48 = vpop.eup %1422  ;;  %v967_v63 = vmul.f32 0.6931472, %v1421_v62 }
  0x7a   : > { %v1425_v45 = vpop.eup %1424  ;;  %v969_v60 = vmul.f32 0.6931472, %v1423_v48  ;;  %v972_v5 = vmul.f32 %v965_v35, %v956_v37 }
  0x7b   : > { %v1427_v55 = vpop.eup %1426  ;;  %v971_v58 = vmul.f32 0.6931472, %v1425_v45  ;;  %v973_v6 = vmul.f32 %v967_v63, %v957_v29 }
  0x7c   : > { %v1429_v32 = vpop.eup %1428  ;;  %v974_v46 = vmul.f32 %v969_v60, %v958_v14  ;;  %v1003_v10 = vmul.f32 0.6931472, %v1427_v55 }
  0x7d   : > { %v1431_v13 = vpop.eup %1430  ;;  %v975_v33 = vmul.f32 %v971_v58, %v959_v42  ;;  %v976_v18 = vadd.f32 %v973_v6, %v972_v5  ;;  %v1005_v25 = vmul.f32 0.6931472, %v1429_v32 }
  0x7e   : > { %v1433_v43 = vpop.eup %1432  ;;  %v978_v17 = vsel %vm977_vm1, %v974_v46, 0.0  ;;  %v1007_v41 = vmul.f32 0.6931472, %v1431_v13  ;;  %v1014_v50 = vmul.f32 %v1010_v20, %v1003_v10 }
  0x7f   : > { %v979_v23 = vadd.f32 %v978_v17, %v976_v18  ;;  %v980_v15 = vsel %vm977_vm1, %v975_v33, 0.0  ;;  %v1009_v59 = vmul.f32 0.6931472, %v1433_v43  ;;  %v1015_v2 = vmul.f32 %v1011_v47, %v1005_v25 }
  0x80   : > { %v1016_v56 = vmul.f32 %v1012_v51, %v1007_v41  ;;  %1018 = vst [vmem:[%s481_s23] sm:$0xff] %v1014_v50 }
  0x81   : > { %v981_v27 = vadd.f32 %v980_v15, %v979_v23  ;;  %v1017_v44 = vmul.f32 %v1013_v0, %v1009_v59  ;;  %1019 = vst [vmem:[%s481_s23 + $0x8] sm:$0xff] %v1015_v2 }
  0x82   : > { %1020 = vst [vmem:[%s481_s23 + $0x10] sm:$0x3] %v1016_v56 }
  0x83   : > { %1021 = vst [vmem:[%s481_s23 + $0x18] sm:$0x3] %v1017_v44  ;;  %982 = vadd.xlane.f32.xlu0 %v981_v27  ;;  %s1438_s23 = sshll.u32 %s1543_s22, 4  ;;  %s1439_s23 = int_to_ptr.vmem [resolvable:$false] %s1438_s23 }
  0x84   : > { %s1440_s30 = scalar_lea.vmem %s1439_s23, 256  ;;  %p1441_p1 = scmp.lt.s32.totalorder %s1051_s12, %s1439_s23 }
  0x85   : > { %p1442_p2 = scmp.lt.s32.totalorder %s1440_s30, %s1434_s21 }
  0x87   : > { %p1443_p3 = por %p1442_p2, %p1441_p1 }
  0x89   : > { %p1444_p5 = pnand %p1443_p3, %p1437_p0 }
  0xf3   : > { %v920_v19 = vpop.xlane.xlu0 %919 }
  0xf4   : > { %v921_v52 = vrot.slane %v920_v19, 4 }
  0xf6   : > { %v922_v38 = vadd.f32 %v921_v52, %v920_v19 }
  0xf8   : > { %v923_v30 = vrot.slane %v922_v38, 2 }
  0xfa   : > { %v924_v16 = vadd.f32 %v923_v30, %v922_v38 }
  0xfc   : > { %v925_v22 = vrot.slane %v924_v16, 1 }
  0xfe   : > { %v926_v3 = vadd.f32 %v925_v22, %v924_v16 }
 0x100   : > { %1333 = vpush %v926_v3 }
 0x10c   : > { %v983_v49 = vpop.xlane.xlu0 %982 }
 0x10d   : > { %v984_v26 = vrot.slane %v983_v49, 4 }
 0x10f   : > { %v985_v53 = vadd.f32 %v984_v26, %v983_v49 }
 0x111   : > { %v986_v21 = vrot.slane %v985_v53, 2 }
 0x113   : > { %v987_v39 = vadd.f32 %v986_v21, %v985_v53 }
 0x115   : > { %v988_v40 = vrot.slane %v987_v39, 1 }
 0x117   : > { %v989_v36 = vadd.f32 %v988_v40, %v987_v39 }
 0x119   : > { %1335 = vpush %v989_v36 }
 0x131   : > { %s1334_s15 = spop %1333 }
 0x132   : > { %v928_v31 = vstv %s1334_s15 }
 0x133   : > { %930 = vst [vmem:[%s404_s10] sm:$0xff] %v928_v31 }
 0x134   : > { %1447 = shalt.err (!%p1444_p5)
}
 0x135   : > { %s1448_s15 = scalar_lea.hbm %s1048_s19, 128  ;;  %s1452_s18 = scalar_lea.hbm %s2176_s5, 256 }
 0x136   : > { %p1449_p6 = scmp.ne.s32.totalorder %s1048_s19, %s1448_s15  ;;  %p1453_p10 = scmp.lt.s32.totalorder %s1048_s19, %s2176_s5 }
 0x137   : > { %p1454_p11 = scmp.lt.s32.totalorder %s1452_s18, %s1448_s15 }
 0x138   : > { %p1450_p7 = pnand %p1449_p6, %p1625_p4 }
 0x139   : > { %p1455_p12 = por %p1454_p11, %p1453_p10 }
 0x13a   : > { %p1451_p9 = pneg %p1450_p7 }
 0x13c   : > { %p1456_p13 = pnand %p1455_p12, %p1451_p9 }
 0x13e   : > { %1459 = shalt.err (!%p1456_p13)
}
 0x13f   : > { %1337 = dma.vmem_to_hbm [thread:$0]  (%p1625_p4), %s1051_s12, 128, %s1048_s19, %s1023_s20  }
 0x140   : > { %s2190_s30 = sshll.u32 %s2105_s16, 3  ;;  %s2191_s10 = sshll.u32 %s1532_s27, 7 }
 0x141   : > { %s411_s21 = scalar_lea.vmem [#allocation4], %s2190_s30  ;;  %s1061_s8 = scalar_lea.hbm %s2177_s6, %s2191_s10 }
 0x142   : > { %s1063_s22 = sshll.u32 %s411_s21, 4  ;;  %s1028_s15 = scalar_lea.sflag [#allocation5], %s2105_s16  ;;  %s1064_s22 = int_to_ptr.vmem [resolvable:$true] %s1063_s22 }
 0x143   : > { %s1460_s18 = scalar_lea.vmem %s1064_s22, 128  ;;  %s1544_s1 = smov [#allocation4]  }
 0x144   : > { %p1461_p0 = scmp.ne.s32.totalorder %s1064_s22, %s1460_s18  ;;  %s1464_s12 = sshll.u32 %s1544_s1, 4  ;;  %s1465_s12 = int_to_ptr.vmem [resolvable:$false] %s1464_s12 }
 0x145   : > { %s1466_s19 = scalar_lea.vmem %s1465_s12, 256  ;;  %p1467_p3 = scmp.lt.s32.totalorder %s1064_s22, %s1465_s12 }
 0x146   : > { %p1462_p1 = pnand %p1461_p0, %p1625_p4  ;;  %p1468_p5 = scmp.lt.s32.totalorder %s1466_s19, %s1460_s18 }
 0x148   : > { %p1463_p2 = pneg %p1462_p1  ;;  %p1469_p6 = por %p1468_p5, %p1467_p3 }
 0x14a   : > { %s1336_s23 = spop %1335  ;;  %p1470_p7 = pnand %p1469_p6, %p1463_p2 }
 0x14b   : > { %v991_v28 = vstv %s1336_s23 }
 0x14c   : > { %993 = vst [vmem:[%s411_s21] sm:$0xff] %v991_v28 }
 0x14d   : > { %1473 = shalt.err (!%p1470_p7)
}
 0x14e   : > { %s1474_s27 = scalar_lea.hbm %s1061_s8, 128  ;;  %s1478_s30 = scalar_lea.hbm %s2177_s6, 256 }
 0x14f   : > { %p1475_p9 = scmp.ne.s32.totalorder %s1061_s8, %s1474_s27  ;;  %p1479_p12 = scmp.lt.s32.totalorder %s1061_s8, %s2177_s6 }
 0x150   : > { %p1480_p13 = scmp.lt.s32.totalorder %s1478_s30, %s1474_s27 }
 0x151   : > { %p1476_p10 = pnand %p1475_p9, %p1625_p4 }
 0x152   : > { %p1481_p0 = por %p1480_p13, %p1479_p12 }
 0x153   : > { %p1477_p11 = pneg %p1476_p10 }
 0x155   : > { %p1482_p1 = pnand %p1481_p0, %p1477_p11 }
 0x157   : > { %1485 = shalt.err (!%p1482_p1)
}
 0x158   : > { %1338 = dma.vmem_to_hbm [thread:$0]  (%p1625_p4), %s1064_s22, 128, %s1061_s8, %s1028_s15  }
 0x159 PF: > { %p1348_p2 = scmp.ge.s32.totalorder %s1540_s29, 2  ;;  %s1079_s1 = sand.u32 1, %s1520_s24  }
 0x15a   : > { %s1080_s10 = scalar_lea.sflag [#allocation3], %s1079_s1 }
 0x15b   : > { %p1342_p3 = pnand %p1348_p2, %p1632_p8 }
 0x15d   : > { %p1343_p5 = pneg %p1342_p3 }
 0x15f   : > { %1511 = dma.done.wait (%p1343_p5), %s1080_s10, 128  }
 0x160   : > { %1513 = vsyncadd (%p1343_p5), %s1080_s10, 4294967168  ;;  %s1089_s17 = scalar_lea.sflag [#allocation5], %s1079_s1 }
 0x161   : > { %1515 = dma.done.wait (%p1343_p5), %s1089_s17, 128  }
 0x162   : > { %1517 = vsyncadd (%p1343_p5), %s1089_s17, 4294967168  ;;  %s24_s29 = sadd.s32 1, %s1540_s29   ;;  %s2192_s24 = smov %s1524_s25 }
 0x163   : > { %p21_p6 = scmp.ge.s32.totalorder %s24_s29, 4   ;;  %s2193_s25 = smov %s1528_s26 }
 0x164   : > { %s2194_s26 = smov %s1638_s14  ;;  %s2195_s27 = smov %s1536_s28 }
 0x165   : > { %s2196_s28 = smov %s2198_s9  ;;  %23 = sbr.rel (!%p21_p6) target bundleno = 9 (0x9), region = 120 }
 0x16a   :  { %1106 = vsyncpa [#allocation3], 1 }
 0x16b   :  { %1108 = vsyncpa [#allocation3 + $0x1], 1 }
 0x16c   :  { %1109 = vsyncpa [#allocation5], 1 }
 0x16d   :  { %1111 = vsyncpa [#allocation5 + $0x1], 1 }

</bundles_post_ra>
